<compile_context>
chip_gen: v6e
topology: v6e:2x2x1
jax: 0.10.0
libtpu: 0.0.40
codegen_flags: <defaults>
</compile_context>

<pallas_src>
import jax
import jax.numpy as jnp
from jax.experimental import pallas as pl
from jax.experimental.pallas import tpu as pltpu


def _round_up(x: int, m: int) -> int:
    return ((x + m - 1) // m) * m


# ----------------------------- Pallas kernel ---------------------------------
def pose_mlp_kernel(x_ref, w1_ref, b1_ref, w2_ref, b2_ref, o_ref, acc_ref):
    # Grid axis 0 tiles the D_in reduction of the first matmul.
    #   x:  (Bp, tk) bf16      w1: (tk, Hp) bf16    b1: (1, Hp) f32
    #   w2: (Hp, Ap) bf16      b2: (1, Ap) f32      o:  (Bp, Ap) f32
    #   acc_ref: (Bp, Hp) f32 scratch accumulator (persists across grid steps)
    k = pl.program_id(0)

    @pl.when(k == 0)
    def _():
        acc_ref[...] = jnp.zeros_like(acc_ref)

    acc_ref[...] += jnp.dot(
        x_ref[...], w1_ref[...], preferred_element_type=jnp.float32
    )

    @pl.when(k == pl.num_programs(0) - 1)
    def _():
        h = acc_ref[...] + b1_ref[...]                       # f32 bias add (VPU)
        o = jnp.dot(
            h.astype(w2_ref.dtype), w2_ref[...], preferred_element_type=jnp.float32
        ) + b2_ref[...]
        o_ref[...] = o.astype(o_ref.dtype)


# --------------------------- one-time weight prep ------------------------------
def prepare_padded_params(params, *, tk=512):
    """Pad + cast weights once (outside the per-call hot path).

    W1: (D_in, H) -> (Dp, Hp) bf16 with Dp a multiple of tk, Hp a multiple of 128.
    W2: (H, A)    -> (Hp, Ap) bf16. Biases stay f32 as (1, Hp)/(1, Ap) rows.
    Zero padding is exact for the matmuls.
    """
    W1, b1, W2, b2 = params["W1"], params["b1"], params["W2"], params["b2"]
    D_in, H = W1.shape
    A = W2.shape[1]
    Dp = _round_up(D_in, tk)
    Hp = _round_up(H, 128)
    Ap = _round_up(A, 128)

    W1_p = jnp.zeros((Dp, Hp), jnp.bfloat16).at[:D_in, :H].set(W1.astype(jnp.bfloat16))
    b1_p = jnp.zeros((1, Hp), jnp.float32).at[0, :H].set(b1)
    W2_p = jnp.zeros((Hp, Ap), jnp.bfloat16).at[:H, :A].set(W2.astype(jnp.bfloat16))
    b2_p = jnp.zeros((1, Ap), jnp.float32).at[0, :A].set(b2)

    return {
        "W1_p": W1_p, "b1_p": b1_p, "W2_p": W2_p, "b2_p": b2_p,
        "D_in": D_in, "A": A, "Dp": Dp, "Hp": Hp, "Ap": Ap, "tk": tk,
    }


def _vmem_limit_bytes(Bp, tk, Hp, Ap):
    bf, f32 = 2, 4
    est = (
        2 * Bp * tk * bf              # x tiles (double-buffered)
        + 2 * tk * Hp * bf            # W1 tiles (double-buffered)
        + 2 * Hp * Ap * bf            # W2 (resident, double-buffered)
        + 2 * Hp * f32 + 2 * Ap * f32  # biases
        + 2 * Bp * Ap * f32           # output
        + Bp * Hp * f32               # scratch accumulator
    )
    # Generous headroom, but stay well below the smallest physical VMEM (v7x: 64 MiB).
    return min(2 * est + (8 << 20), 48 << 20)


# ----------------------------- kernel launcher ---------------------------------
def _run_pred_net(x, pp):
    """x: (bs, D_in) f32 -> (bs, action_dim) f32 via the Pallas MLP kernel."""
    bs = x.shape[0]
    D_in, A = pp["D_in"], pp["A"]
    Dp, Hp, Ap, tk = pp["Dp"], pp["Hp"], pp["Ap"], pp["tk"]

    Bp = _round_up(max(bs, 1), 16)  # bf16 sublane tile is 16 rows
    # Only the activation is padded per call (weights were padded once).
    x_p = jnp.zeros((Bp, Dp), jnp.bfloat16).at[:bs, :D_in].set(x.astype(jnp.bfloat16))

    grid = (Dp // tk,)
    out_p = pl.pallas_call(
        pose_mlp_kernel,
        out_shape=jax.ShapeDtypeStruct((Bp, Ap), jnp.float32),
        grid_spec=pltpu.PrefetchScalarGridSpec(
            num_scalar_prefetch=0,
            grid=grid,
            in_specs=[
                pl.BlockSpec((Bp, tk), lambda k: (0, k)),   # x:   stream K tiles
                pl.BlockSpec((tk, Hp), lambda k: (k, 0)),   # W1:  stream K tiles
                pl.BlockSpec((1, Hp), lambda k: (0, 0)),    # b1:  resident
                pl.BlockSpec((Hp, Ap), lambda k: (0, 0)),   # W2:  resident
                pl.BlockSpec((1, Ap), lambda k: (0, 0)),    # b2:  resident
            ],
            out_specs=pl.BlockSpec((Bp, Ap), lambda k: (0, 0)),
            scratch_shapes=[pltpu.VMEM((Bp, Hp), jnp.float32)],
        ),
        compiler_params=pltpu.CompilerParams(
            dimension_semantics=("arbitrary",),             # reduction axis
            vmem_limit_bytes=_vmem_limit_bytes(Bp, tk, Hp, Ap),
        ),
    )(x_p, pp["W1_p"], pp["b1_p"], pp["W2_p"], pp["b2_p"])

    return out_p[:bs, :A]


# ------------------------------ forward glue ----------------------------------
def pose_predictor_forward(padded_params, latents, depth_latents, proprio, action, noise_key):
    """Mirrors PosePredictor.forward.

    latents, depth_latents: (bs, m, C, H, W); proprio/action: (bs, 7).
    Returns (translation (bs,3), rotation (bs,3), gripper (bs,1), noise (bs,7)).
    """
    bs = proprio.shape[0]
    overall = jnp.concatenate((latents, depth_latents), axis=1)          # (bs, 2m, C, H, W)
    overall = overall.reshape(overall.shape[0], overall.shape[1], overall.shape[2], -1)
    overall = overall.reshape(bs, -1)                                    # (bs, 2m*C*H*W)
    x = jnp.concatenate((overall, proprio), axis=1)                      # (bs, D_in)

    # torch.randn(action.shape) equivalent (deterministic via explicit key)
    noise = jax.random.normal(noise_key, action.shape, dtype=jnp.float32)

    next_wpt = _run_pred_net(x, padded_params)
    translation = next_wpt[:, :3]
    rotation = next_wpt[:, 3:6]
    gripper = next_wpt[:, 6:]
    return translation, rotation, gripper, noise


def init_params(key, d_in, num_latents, action_dim):
    """Deterministic init matching nn.Linear shapes (stored as (in, out))."""
    k1, k2, k3, k4 = jax.random.split(key, 4)
    s1 = 1.0 / jnp.sqrt(jnp.float32(d_in))
    s2 = 1.0 / jnp.sqrt(jnp.float32(num_latents))
    return {
        "W1": jax.random.uniform(k1, (d_in, num_latents), jnp.float32, -s1, s1),
        "b1": jax.random.uniform(k2, (num_latents,), jnp.float32, -s1, s1),
        "W2": jax.random.uniform(k3, (num_latents, action_dim), jnp.float32, -s2, s2),
        "b2": jax.random.uniform(k4, (action_dim,), jnp.float32, -s2, s2),
    }


if __name__ == "__main__":
    # Small shapes consistent with the module:
    #   CAMERAS -> num_views = 2, obs_dim = H*W*C*2 (rgb-latents + depth-latents)
    bs = 2
    num_views = 2
    C, Hs, Ws = 4, 8, 8
    action_dim = 7
    num_latents = 128  # scaled-down from 512 for a small synthetic run

    obs_dim = Hs * Ws * C * 2
    d_in = obs_dim * num_views + action_dim  # 1024 + 7 = 1031

    root = jax.random.PRNGKey(0)
    k_lat, k_dep, k_prop, k_act, k_param, k_noise = jax.random.split(root, 6)

    latents = jax.random.normal(k_lat, (bs, num_views, C, Hs, Ws), jnp.float32)
    depth_latents = jax.random.normal(k_dep, (bs, num_views, C, Hs, Ws), jnp.float32)
    proprio = jax.random.normal(k_prop, (bs, action_dim), jnp.float32)
    action = jax.random.normal(k_act, (bs, action_dim), jnp.float32)

    params = init_params(k_param, d_in, num_latents, action_dim)
    padded = prepare_padded_params(params, tk=512)   # one-time weight pad+cast (not per call)

    translation, rotation, gripper, noise = jax.block_until_ready(
        pose_predictor_forward(padded, latents, depth_latents, proprio, action, k_noise)
    )

    # Reference check: same bf16-quantized operands, f32 accumulation (matches kernel math).
    overall = jnp.concatenate((latents, depth_latents), axis=1).reshape(bs, -1)
    x_full = jnp.concatenate((overall, proprio), axis=1)
    x_bf = x_full.astype(jnp.bfloat16).astype(jnp.float32)
    W1_bf = params["W1"].astype(jnp.bfloat16).astype(jnp.float32)
    W2_bf = params["W2"].astype(jnp.bfloat16).astype(jnp.float32)
    h_ref = x_bf @ W1_bf + params["b1"]
    ref = h_ref.astype(jnp.bfloat16).astype(jnp.float32) @ W2_bf + params["b2"]
    got = jnp.concatenate([translation, rotation, gripper], axis=1)

    assert translation.shape == (bs, 3)
    assert rotation.shape == (bs, 3)
    assert gripper.shape == (bs, 1)
    assert noise.shape == (bs, action_dim)
    assert jnp.allclose(got, ref, atol=5e-2, rtol=5e-2)

    print("KERNEL_OK")
</pallas_src>

<mosaic_0001>
module attributes {stable_mosaic.version = 11 : i64} {
  func.func @pose_mlp_kernel(%arg0: i32, %arg1: memref<16x512xbf16, #tpu.memory_space<vmem>>, %arg2: memref<512x128xbf16, #tpu.memory_space<vmem>>, %arg3: memref<1x128xf32, #tpu.memory_space<vmem>>, %arg4: memref<128x128xbf16, #tpu.memory_space<vmem>>, %arg5: memref<1x128xf32, #tpu.memory_space<vmem>>, %arg6: memref<16x128xf32, #tpu.memory_space<vmem>>, %arg7: memref<16x128xf32, #tpu.memory_space<vmem>>) attributes {dimension_semantics = [#tpu.dimension_semantics<arbitrary>], iteration_bounds = array<i64: 3>, scalar_prefetch = 0 : i64, scratch_operands = 1 : i64, tpu.core_type = #tpu.core_type<tc>, window_params = [{transform_indices = @transform_0, window_bounds = array<i64: 16, 512>}, {transform_indices = @transform_1, window_bounds = array<i64: 512, 128>}, {pipeline_mode = #tpu.pipeline_mode<synchronous>, transform_indices = @transform_2, window_bounds = array<i64: 1, 128>}, {pipeline_mode = #tpu.pipeline_mode<synchronous>, transform_indices = @transform_3, window_bounds = array<i64: 128, 128>}, {pipeline_mode = #tpu.pipeline_mode<synchronous>, transform_indices = @transform_4, window_bounds = array<i64: 1, 128>}, {pipeline_mode = #tpu.pipeline_mode<synchronous>, transform_indices = @transform_5, window_bounds = array<i64: 16, 128>}]} {
    %c0_i32 = arith.constant 0 : i32
    %0 = arith.cmpi eq, %arg0, %c0_i32 : i32
    %1 = arith.extui %0 : i1 to i32
    %c0_i32_0 = arith.constant 0 : i32
    %2 = arith.cmpi ne, %1, %c0_i32_0 : i32
    scf.if %2 {
      %cst_9 = arith.constant 0.000000e+00 : f32
      %12 = vector.broadcast %cst_9 : f32 to vector<16x128xf32>
      %c0_10 = arith.constant 0 : index
      %c0_11 = arith.constant 0 : index
      %13 = vector.load %arg7[%c0_10, %c0_11] : memref<16x128xf32, #tpu.memory_space<vmem>>, vector<16x128xf32>
      tpu.vector_store %arg7[%c0_10, %c0_11], %12 {strides = array<i32>} : memref<16x128xf32, #tpu.memory_space<vmem>>, vector<16x128xf32>,
    } else {
    }
    %c0 = arith.constant 0 : index
    %c0_1 = arith.constant 0 : index
    %3 = vector.load %arg7[%c0, %c0_1] : memref<16x128xf32, #tpu.memory_space<vmem>>, vector<16x128xf32>
    %c0_2 = arith.constant 0 : index
    %c0_3 = arith.constant 0 : index
    %4 = vector.load %arg1[%c0_2, %c0_3] : memref<16x512xbf16, #tpu.memory_space<vmem>>, vector<16x512xbf16>
    %c0_4 = arith.constant 0 : index
    %c0_5 = arith.constant 0 : index
    %5 = vector.load %arg2[%c0_4, %c0_5] : memref<512x128xbf16, #tpu.memory_space<vmem>>, vector<512x128xbf16>
    %cst = arith.constant dense<0.000000e+00> : vector<16x128xf32>
    %6 = tpu.matmul %4, %5, %cst {dimension_numbers = #tpu.dot_dimension_numbers<[1], [0], [0], [1], [0, 0, 1, 1], [], []>} : vector<16x512xbf16>, vector<512x128xbf16>, vector<16x128xf32> -> vector<16x128xf32>
    %7 = arith.addf %3, %6 : vector<16x128xf32>
    %c0_6 = arith.constant 0 : index
    %c0_7 = arith.constant 0 : index
    %8 = vector.load %arg7[%c0_6, %c0_7] : memref<16x128xf32, #tpu.memory_space<vmem>>, vector<16x128xf32>
    tpu.vector_store %arg7[%c0_6, %c0_7], %7 {strides = array<i32>} : memref<16x128xf32, #tpu.memory_space<vmem>>, vector<16x128xf32>,
    %c2_i32 = arith.constant 2 : i32
    %9 = arith.cmpi eq, %arg0, %c2_i32 : i32
    %10 = arith.extui %9 : i1 to i32
    %c0_i32_8 = arith.constant 0 : i32
    %11 = arith.cmpi ne, %10, %c0_i32_8 : i32
    scf.if %11 {
      %c0_9 = arith.constant 0 : index
      %c0_10 = arith.constant 0 : index
      %12 = vector.load %arg7[%c0_9, %c0_10] : memref<16x128xf32, #tpu.memory_space<vmem>>, vector<16x128xf32>
      %c0_11 = arith.constant 0 : index
      %c0_12 = arith.constant 0 : index
      %13 = vector.load %arg3[%c0_11, %c0_12] : memref<1x128xf32, #tpu.memory_space<vmem>>, vector<1x128xf32>
      %14 = vector.broadcast %13 : vector<1x128xf32> to vector<16x128xf32>
      %15 = arith.addf %12, %14 : vector<16x128xf32>
      %16 = arith.truncf %15 : vector<16x128xf32> to vector<16x128xbf16>
      %c0_13 = arith.constant 0 : index
      %c0_14 = arith.constant 0 : index
      %17 = vector.load %arg4[%c0_13, %c0_14] : memref<128x128xbf16, #tpu.memory_space<vmem>>, vector<128x128xbf16>
      %cst_15 = arith.constant dense<0.000000e+00> : vector<16x128xf32>
      %18 = tpu.matmul %16, %17, %cst_15 {dimension_numbers = #tpu.dot_dimension_numbers<[1], [0], [0], [1], [0, 0, 1, 1], [], []>} : vector<16x128xbf16>, vector<128x128xbf16>, vector<16x128xf32> -> vector<16x128xf32>
      %c0_16 = arith.constant 0 : index
      %c0_17 = arith.constant 0 : index
      %19 = vector.load %arg5[%c0_16, %c0_17] : memref<1x128xf32, #tpu.memory_space<vmem>>, vector<1x128xf32>
      %20 = vector.broadcast %19 : vector<1x128xf32> to vector<16x128xf32>
      %21 = arith.addf %18, %20 : vector<16x128xf32>
      %c0_18 = arith.constant 0 : index
      %c0_19 = arith.constant 0 : index
      %22 = vector.load %arg6[%c0_18, %c0_19] : memref<16x128xf32, #tpu.memory_space<vmem>>, vector<16x128xf32>
      tpu.vector_store %arg6[%c0_18, %c0_19], %21 {strides = array<i32>} : memref<16x128xf32, #tpu.memory_space<vmem>>, vector<16x128xf32>,
    } else {
    }
    return
  }
  func.func @transform_0(%arg0: i32) -> (i32, i32) {
    %c0_i32 = arith.constant 0 : i32
    %c0_i32_0 = arith.constant 0 : i32
    return %c0_i32, %arg0 : i32, i32
  }
  func.func @transform_1(%arg0: i32) -> (i32, i32) {
    %c0_i32 = arith.constant 0 : i32
    %c0_i32_0 = arith.constant 0 : i32
    return %arg0, %c0_i32 : i32, i32
  }
  func.func @transform_2(%arg0: i32) -> (i32, i32) {
    %c0_i32 = arith.constant 0 : i32
    %c0_i32_0 = arith.constant 0 : i32
    %c0_i32_1 = arith.constant 0 : i32
    return %c0_i32, %c0_i32_0 : i32, i32
  }
  func.func @transform_3(%arg0: i32) -> (i32, i32) {
    %c0_i32 = arith.constant 0 : i32
    %c0_i32_0 = arith.constant 0 : i32
    %c0_i32_1 = arith.constant 0 : i32
    return %c0_i32, %c0_i32_0 : i32, i32
  }
  func.func @transform_4(%arg0: i32) -> (i32, i32) {
    %c0_i32 = arith.constant 0 : i32
    %c0_i32_0 = arith.constant 0 : i32
    %c0_i32_1 = arith.constant 0 : i32
    return %c0_i32, %c0_i32_0 : i32, i32
  }
  func.func @transform_5(%arg0: i32) -> (i32, i32) {
    %c0_i32 = arith.constant 0 : i32
    %c0_i32_0 = arith.constant 0 : i32
    %c0_i32_1 = arith.constant 0 : i32
    return %c0_i32, %c0_i32_0 : i32, i32
  }
}

</mosaic_0001>

<bundles_post_ra>
// kernel: tpu_custom_call.1
= control target key start
LH: loop header
LB: loop body
LE: loop exit
PB: predicated region body
PF: predicated region fallthrough
CT: control target
= control target key end

     0   :  { %s1581_s0 = inlined_call_operand.hbm [shape: bf16[16,1536], index: 0, kind: input, shape index: {}]   ;;  %s1582_s1 = inlined_call_operand.hbm [shape: bf16[1536,128], index: 1, kind: input, shape index: {}]   ;;  %s1583_s2 = inlined_call_operand.vmem [shape: f32[1,128], index: 2, kind: input, shape index: {}]   ;;  %s1584_s3 = inlined_call_operand.hbm [shape: bf16[128,128], index: 3, kind: input, shape index: {}]   ;;  %s1585_s4 = inlined_call_operand.vmem [shape: f32[1,128], index: 4, kind: input, shape index: {}]   ;;  %s1586_s5 = inlined_call_operand.hbm [shape: f32[16,128], index: 5, kind: output, shape index: {}]  }
   0x1   :  { %1591 = sst [smem:[#allocation14_spill]] %s1581_s0 }
   0x2   :  { %10 = vsyncpa [#allocation4], 0 }
   0x3   :  { %12 = vsyncpa [#allocation4 + $0x1], 0 }
   0x4   :  { %13 = vsyncpa [#allocation7], 0 }
   0x5   :  { %15 = vsyncpa [#allocation7 + $0x1], 0 }
   0x6   :  { %16 = vsyncpa [#allocation5], 0  ;;  %s1340_s18 = smov 0   ;;  %s1342_s19 = smov 0  }
   0x7   :  { %s1344_s20 = smov 0   ;;  %s1346_s21 = smov 0  }
   0x8 LB: > { %s1359_s22 = sadd.s32 4294967295, %s1294_s21   ;;  %s1362_s23 = sadd.s32 1, %s1294_s21   ;;  %s1294_s21 = sphi %s1346_s21, %s1607_s21   ;;  %s1290_s20 = sphi %s1344_s20, %s1606_s20   ;;  %s1286_s19 = sphi %s1342_s19, %s1605_s19   ;;  %s1282_s18 = sphi %s1340_s18, %s1604_s18  }
   0x9   : > { %s26_s24 = ssub.s32 %s1294_s21, %s1362_s23  ;;  %s29_s25 = sadd.s32 1, %s1290_s20 }
   0xa   : > { %p27_p0 = scmp.eq.s32.totalorder %s26_s24, 0  ;;  %p36_p1 = scmp.ne.s32.totalorder %s1290_s20, %s1286_s19 }
   0xb   : > { %p37_p2 = scmp.eq.s32.totalorder %s1294_s21, 0  ;;  %p42_p3 = scmp.ne.s32.totalorder %s1286_s19, %s1282_s18 }
   0xc   : > { %s1372_s26 = scalar_select %p27_p0, %s1290_s20, %s29_s25  }
   0xd   : > { %p1374_p4 = por %p37_p2, %p36_p1  ;;  %p1587_p5 = scmp.eq.s32.totalorder %s1359_s22, 0 }
   0xe   : > { %p884_p6 = scmp.ge.s32.totalorder %s1294_s21, 1  ;;  %p163_p7 = scmp.lt.s32.totalorder %s1294_s21, 4 }
   0xf   : > { %p1383_p8 = por %p1587_p5, %p42_p3  ;;  %s1296_s30 = smov [#allocation8]  }
  0x10   : > { %p1388_p10 = pnand %p884_p6, %p163_p7  ;;  %s178_s6 = sshll.u32 %s1296_s30, 4  ;;  %s179_s6 = int_to_ptr.vmem [resolvable:$true] %s178_s6 }
  0x11   : > { %s1593_s28 = scalar_select %p1383_p8, 1, 0 }
  0x12   : > { %p1036_p11 = pneg %p1388_p10  ;;  %p1048_p13 = scmp.lt.s32.totalorder %s1294_s21, 3 }
  0x13   : > { %s1402_s8 = sand.u32 1, %s1290_s20   ;;  %s949_s9 = sshll.u32 %s1294_s21, 8 }
  0x14   : > { %p1396_p12 = pnand %p1036_p11, %p1587_p5  ;;  %p1407_p0 = pnand %p1048_p13, %p1374_p4 }
  0x15   : > { %s1153_s11 = scalar_lea.vmem %s179_s6, 1024  ;;  %p1161_p7 = scmp.lt.s32.totalorder %s179_s6, %s179_s6 }
  0x16   : > { %p1144_p1 = pneg %p1396_p12  ;;  %p1154_p2 = scmp.ne.s32.totalorder %s179_s6, %s1153_s11 }
  0x17   : > { %p1162_p11 = scmp.lt.s32.totalorder %s1153_s11, %s1153_s11 }
  0x18   : > { %p1156_p3 = pnand %p1154_p2, %p1144_p1 }
  0x19   : > { %p1163_p9 = por %p1162_p11, %p1161_p7 }
  0x1a   : > { %p1157_p6 = pneg %p1156_p3 }
  0x1c   : > { %p1164_p5 = pnand %p1163_p9, %p1157_p6 }
  0x1e   : > { %1167 = shalt.err (!%p1164_p5)
}
  0x1f   : > { %s1589_s12 = smov 64   ;;  %s1590_s13 = smov 4  }
  0x20   : > { %1039 = dma.hbm_to_vmem [thread:$0]  (!%p1396_p12), %s1584_s3, 1024, %s179_s6, [#allocation7], %s1589_s12, %s1589_s12, %s1590_s13  }
  0x21   : > { %s887_s16 = sshll.u32 %s1402_s8, 5  ;;  %s1597_s0 = sld [smem:[#allocation14_spill]] }
  0x22   : > { %s199_s25 = scalar_lea.vmem [#allocation3], %s887_s16  ;;  %s196_s30 = scalar_lea.sflag [#allocation4], %s1402_s8 }
  0x23   : > { %s206_s27 = sshll.u32 %s199_s25, 4  ;;  %p1170_p5 = pneg %p1407_p0  ;;  %s1427_s27 = int_to_ptr.vmem [resolvable:$true] %s206_s27 }
  0x27   : > { %s1425_s24 = scalar_lea.hbm %s1597_s0, %s949_s9  ;;  %s1173_s9 = scalar_lea.hbm %s1597_s0, 1536 }
  0x28   : > { %s1168_s7 = scalar_lea.hbm %s1425_s24, 512  ;;  %p1174_p13 = scmp.lt.s32.totalorder %s1425_s24, %s1597_s0 }
  0x29   : > { %p1169_p4 = scmp.ne.s32.totalorder %s1425_s24, %s1168_s7  ;;  %p1175_p1 = scmp.lt.s32.totalorder %s1173_s9, %s1168_s7 }
  0x2b   : > { %p1171_p9 = pnand %p1170_p5, %p1169_p4  ;;  %p1176_p2 = por %p1175_p1, %p1174_p13 }
  0x2d   : > { %p1172_p12 = pneg %p1171_p9 }
  0x2f   : > { %p1177_p3 = pnand %p1176_p2, %p1172_p12 }
  0x31   : > { %1180 = shalt.err (!%p1177_p3)
}
  0x32   : > { %s1181_s16 = scalar_lea.vmem %s1427_s27, 512  ;;  %s1299_s17 = smov [#allocation3]  }
  0x33   : > { %p1182_p6 = scmp.ne.s32.totalorder %s1427_s27, %s1181_s16  ;;  %s1186_s18 = sshll.u32 %s1299_s17, 4  ;;  %s1187_s18 = int_to_ptr.vmem [resolvable:$false] %s1186_s18 }
  0x34   : > { %s1188_s25 = scalar_lea.vmem %s1187_s18, 1024  ;;  %p1189_p4 = scmp.lt.s32.totalorder %s1427_s27, %s1187_s18 }
  0x35   : > { %p1184_p7 = pnand %p1182_p6, %p1170_p5  ;;  %p1190_p9 = scmp.lt.s32.totalorder %s1188_s25, %s1181_s16 }
  0x37   : > { %p1185_p11 = pneg %p1184_p7  ;;  %p1191_p8 = por %p1190_p9, %p1189_p4 }
  0x39   : > { %p1192_p13 = pnand %p1191_p8, %p1185_p11 }
  0x3b   : > { %1195 = shalt.err (!%p1192_p13)
}
  0x3c   : > { %s1300_s7 = smov 768   ;;  %s1301_s6 = smov 256  }
  0x3d   : > { %s1302_s11 = smov 16   ;;  %s216_s9 = sand.u32 1, %s1294_s21  }
  0x3e   : > { %1043 = dma.hbm_to_vmem [thread:$0]  (!%p1407_p0), %s1425_s24, 512, %s1427_s27, %s196_s30, %s1300_s7, %s1301_s6, %s1302_s11  }
  0x3f   : > { %s890_s14 = sshll.u32 %s1402_s8, 8  ;;  %s950_s15 = sshll.u32 %s1294_s21, 12 }
  0x40   : > { %s220_s16 = scalar_lea.vmem [#allocation6], %s890_s14  ;;  %s1462_s12 = scalar_lea.hbm %s1582_s1, %s950_s15 }
  0x41   : > { %s227_s17 = sshll.u32 %s220_s16, 4  ;;  %s217_s13 = scalar_lea.sflag [#allocation7], %s216_s9  ;;  %s1464_s17 = int_to_ptr.vmem [resolvable:$true] %s227_s17 }
  0x42   : > { %s1196_s0 = scalar_lea.hbm %s1462_s12, 4096  ;;  %s1201_s24 = scalar_lea.hbm %s1582_s1, 12288 }
  0x43   : > { %p1197_p8 = scmp.ne.s32.totalorder %s1462_s12, %s1196_s0  ;;  %p1202_p2 = scmp.lt.s32.totalorder %s1462_s12, %s1582_s1 }
  0x44   : > { %p1203_p3 = scmp.lt.s32.totalorder %s1201_s24, %s1196_s0 }
  0x45   : > { %p1199_p12 = pnand %p1197_p8, %p1170_p5 }
  0x46   : > { %p1204_p6 = por %p1203_p3, %p1202_p2 }
  0x47   : > { %p1200_p1 = pneg %p1199_p12 }
  0x49   : > { %p1205_p7 = pnand %p1204_p6, %p1200_p1 }
  0x4b   : > { %1208 = shalt.err (!%p1205_p7)
}
  0x4c   : > { %s1209_s7 = scalar_lea.vmem %s1464_s17, 4096  ;;  %s1303_s6 = smov [#allocation6]  }
  0x4d   : > { %p1210_p11 = scmp.ne.s32.totalorder %s1464_s17, %s1209_s7  ;;  %s1214_s11 = sshll.u32 %s1303_s6, 4  ;;  %s1215_s11 = int_to_ptr.vmem [resolvable:$false] %s1214_s11 }
  0x4e   : > { %s1216_s9 = scalar_lea.vmem %s1215_s11, 8192  ;;  %p1217_p13 = scmp.lt.s32.totalorder %s1464_s17, %s1215_s11 }
  0x4f   : > { %p1212_p4 = pnand %p1210_p11, %p1170_p5  ;;  %p1218_p8 = scmp.lt.s32.totalorder %s1216_s9, %s1209_s7 }
  0x51   : > { %p1213_p9 = pneg %p1212_p4  ;;  %p1219_p12 = por %p1218_p8, %p1217_p13 }
  0x53   : > { %p1220_p2 = pnand %p1219_p12, %p1213_p9 }
  0x55   : > { %1223 = shalt.err (!%p1220_p2)
}
  0x56   : > { %s1598_s0 = smov 4   ;;  %s1599_s14 = smov 64  }
  0x57   : > { %1046 = dma.hbm_to_vmem [thread:$0]  (!%p1407_p0), %s1462_s12, 4096, %s1464_s17, %s217_s13, %s1599_s14, %s1599_s14, %s1598_s0  }
  0x58   : > { %239 = sbr.rel (%p1388_p10) target bundleno = 599 (0x257), region = 40  ;;  %s241_s15 = sand.u32 (!%p1388_p10), 1, %s1286_s19  }
  0x59   : > { %s894_s16 = sshll.u32 (!%p1388_p10), %s241_s15, 5  ;;  %s242_s18 = scalar_lea.sflag (!%p1388_p10), [#allocation4], %s241_s15 }
  0x5a   : > { %s1494_s25 = scalar_lea.vmem (!%p1388_p10), [#allocation3], %s894_s16  ;;  %p1600_p5 = scmp.ne.s32.totalorder (!%p1388_p10), %s1593_s28, 0 }
  0x5d   : > { %1265 = dma.done.wait (%p1600_p5), %s242_s18, 512  }
  0x5e   : > { %1267 = vsyncadd (%p1600_p5), %s242_s18, 4294966784  ;;  %s250_s10 = sand.u32 1, %s1359_s22   ;;  %s895_s21 = sshll.u32 %s241_s15, 8 }
  0x5f   : > { %s251_s12 = scalar_lea.sflag [#allocation7], %s250_s10  ;;  %s1501_s13 = scalar_lea.vmem [#allocation6], %s895_s21 }
  0x60   : > { %1269 = dma.done.wait (%p1600_p5), %s251_s12, 4096  }
  0x61   : > { %1271 = vsyncadd (%p1600_p5), %s251_s12, 4294963200  ;;  %p1601_p10 = scmp.eq.s32.totalorder %s1359_s22, 0 }
  0x63   : > { %1273 = dma.done.wait (%p1601_p10), [#allocation7], 1024   ;;  %p1602_p0 = pmov %p1601_p10 }
  0x64   : > { %p1603_p1 = scmp.ne.s32.totalorder %s1359_s22, 0 }
  0x65   : > { %1275 = vsyncadd (%p1602_p0), [#allocation7], 4294966272 }
  0x66   : > { %291 = sbr.rel (%p1603_p1) target bundleno = 109 (0x6d), region = 56 }
  0x6b   : > { %v1304_v0 = vmov 0.0  }
  0x6c   : > { %292 = vst [vmem:[#allocation2] sm:$0xff] %v1304_v0  ;;  %293 = vst [vmem:[#allocation2 + $0x8] sm:$0xff] %v1304_v0 }
  0x6d PF: > { %v1096_v1 = vld [vmem:[%s1501_s13 + $0x78] sm:$0xff]   ;;  %v1100_v5 = vld [vmem:[%s1501_s13 + $0x70] sm:$0xff]   ;;  %v1104_v9 = vld [vmem:[%s1501_s13 + $0x68] sm:$0xff]   ;;  %p934_p3 = scmp.ne.s32.totalorder %s1359_s22, 2 }
  0x6e   : > { %v1097_v2 = vld [vmem:[%s1501_s13 + $0xf8] sm:$0xff]   ;;  %951 = vmatprep.subr.bf16.mxu0 %v1096_v1  ;;  %v1101_v6 = vld [vmem:[%s1501_s13 + $0xf0] sm:$0xff]   ;;  %v1105_v10 = vld [vmem:[%s1501_s13 + $0xe8] sm:$0xff]  }
  0x6f   : > { %v1098_v3 = vld [vmem:[%s1501_s13 + $0x38] sm:$0xff]   ;;  %973 = vmatprep.subr.bf16.mxu1 %v1097_v2  ;;  %v1102_v7 = vld [vmem:[%s1501_s13 + $0x30] sm:$0xff]   ;;  %v1106_v11 = vld [vmem:[%s1501_s13 + $0x28] sm:$0xff]  }
  0x70   : > { %v1099_v4 = vld [vmem:[%s1501_s13 + $0xb8] sm:$0xff]   ;;  %952 = vmatpush3.bf16.msra.mxu0 %v1098_v3  ;;  %v1103_v8 = vld [vmem:[%s1501_s13 + $0xb0] sm:$0xff]   ;;  %v1107_v12 = vld [vmem:[%s1501_s13 + $0xa8] sm:$0xff]  }
  0x71   : > { %974 = vmatpush3.bf16.msra.mxu1 %v1099_v4  ;;  %953 = vmatprep.subr.bf16.mxu0 %v1100_v5  ;;  %v1108_v13 = vld [vmem:[%s1501_s13 + $0x60] sm:$0xff]   ;;  %v1112_v17 = vld [vmem:[%s1501_s13 + $0x58] sm:$0xff]   ;;  %v1116_v21 = vld [vmem:[%s1501_s13 + $0x50] sm:$0xff]  }
  0x72   : > { %975 = vmatprep.subr.bf16.mxu1 %v1101_v6  ;;  %v1109_v14 = vld [vmem:[%s1501_s13 + $0xe0] sm:$0xff]   ;;  %v1113_v18 = vld [vmem:[%s1501_s13 + $0xd8] sm:$0xff]   ;;  %v1117_v22 = vld [vmem:[%s1501_s13 + $0xd0] sm:$0xff]  }
  0x73   : > { %v1110_v15 = vld [vmem:[%s1501_s13 + $0x20] sm:$0xff]   ;;  %v1114_v19 = vld [vmem:[%s1501_s13 + $0x18] sm:$0xff]   ;;  %v1118_v23 = vld [vmem:[%s1501_s13 + $0x10] sm:$0xff]  }
  0x74   : > { %954 = vmatpush3.bf16.msra.mxu0 %v1102_v7  ;;  %v1111_v16 = vld [vmem:[%s1501_s13 + $0xa0] sm:$0xff]   ;;  %v1115_v20 = vld [vmem:[%s1501_s13 + $0x98] sm:$0xff]   ;;  %v1119_v24 = vld [vmem:[%s1501_s13 + $0x90] sm:$0xff]  }
  0x75   : > { %976 = vmatpush3.bf16.msra.mxu1 %v1103_v8  ;;  %955 = vmatprep.subr.bf16.mxu0 %v1104_v9  ;;  %v1120_v25 = vld [vmem:[%s1501_s13 + $0x48] sm:$0xff]   ;;  %v1124_v29 = vld [vmem:[%s1501_s13 + $0x40] sm:$0xff]   ;;  %v294_v44 = vld [vmem:[#allocation2] sm:$0xff] }
  0x76   : > { %977 = vmatprep.subr.bf16.mxu1 %v1105_v10  ;;  %v1121_v26 = vld [vmem:[%s1501_s13 + $0xc8] sm:$0xff]   ;;  %v1125_v30 = vld [vmem:[%s1501_s13 + $0xc0] sm:$0xff]   ;;  %v295_v52 = vld [vmem:[#allocation2 + $0x8] sm:$0xff] }
  0x77   : > { %v1122_v27 = vld [vmem:[%s1501_s13 + $0x8] sm:$0xff]   ;;  %v1126_v31 = vld [vmem:[%s1501_s13] sm:$0xff]  }
  0x78   : > { %956 = vmatpush3.bf16.msra.mxu0 %v1106_v11  ;;  %v1123_v28 = vld [vmem:[%s1501_s13 + $0x88] sm:$0xff]   ;;  %v1127_v32 = vld [vmem:[%s1501_s13 + $0x80] sm:$0xff]  }
  0x79   : > { %978 = vmatpush3.bf16.msra.mxu1 %v1107_v12  ;;  %957 = vmatprep.subr.bf16.mxu0 %v1108_v13  ;;  %v1128_v33 = vld [vmem:[%s1494_s25] ss:$16 sps:$4 sm:$0xff]   ;;  %v1130_v34 = vld [vmem:[%s1494_s25 + $0x4] ss:$16 sps:$4 sm:$0xff]   ;;  %v1131_v35 = vld [vmem:[%s1494_s25 + $0x8] ss:$16 sps:$4 sm:$0xff]  }
  0x7a   : > { %979 = vmatprep.subr.bf16.mxu1 %v1109_v14  ;;  %v1133_v36 = vld [vmem:[%s1494_s25 + $0xc] ss:$16 sps:$4 sm:$0xff]   ;;  %608 = vmatprep.mubr.bf16.mxu0 %v1130_v34 }
  0x7b   : > { %649 = vmatprep.mubr.bf16.mxu1 %v1133_v36 }
  0x7c   : > { %958 = vmatpush3.bf16.msra.mxu0 %v1110_v15 }
  0x7d   : > { %980 = vmatpush3.bf16.msra.mxu1 %v1111_v16  ;;  %959 = vmatprep.subr.bf16.mxu0 %v1112_v17 }
  0x7e   : > { %981 = vmatprep.subr.bf16.mxu1 %v1113_v18 }
  0x80   : > { %960 = vmatpush3.bf16.msra.mxu0 %v1114_v19 }
  0x81   : > { %982 = vmatpush3.bf16.msra.mxu1 %v1115_v20  ;;  %961 = vmatprep.subr.bf16.mxu0 %v1116_v21 }
  0x82   : > { %983 = vmatprep.subr.bf16.mxu1 %v1117_v22 }
  0x84   : > { %962 = vmatpush3.bf16.msra.mxu0 %v1118_v23 }
  0x85   : > { %984 = vmatpush3.bf16.msra.mxu1 %v1119_v24  ;;  %963 = vmatprep.subr.bf16.mxu0 %v1120_v25 }
  0x86   : > { %985 = vmatprep.subr.bf16.mxu1 %v1121_v26 }
  0x88   : > { %964 = vmatpush3.bf16.msra.mxu0 %v1122_v27 }
  0x89   : > { %986 = vmatpush3.bf16.msra.mxu1 %v1123_v28  ;;  %965 = vmatprep.subr.bf16.mxu0 %v1124_v29 }
  0x8a   : > { %987 = vmatprep.subr.bf16.mxu1 %v1125_v30 }
  0x8c   : > { %966 = vmatpush3.bf16.msra.mxu0 %v1126_v31 }
  0x8d   : > { %988 = vmatpush3.bf16.msra.mxu1 %v1127_v32 }
  0x8f   : > { %609 = vmatmul.mubr.bf16.vlgmr.msra.gmra.mxu0 %v1128_v33 }
  0x90   : > { %650 = vmatmul.mubr.bf16.vlgmr.msra.gmra.mxu1 %v1131_v35 }
 0x14f   : > { %v967_v37 = vpop.f32.mrf.mxu0 }
 0x150   : > { %v989_v38 = vpop.f32.mrf.mxu1 }
 0x151   : > { %v968_v39 = vpop.f32.mrf.mxu0 }
 0x152   : > { %v969_v40 = vadd.f32 %v968_v39, %v967_v37  ;;  %v990_v41 = vpop.f32.mrf.mxu1 }
 0x153   : > { %v991_v42 = vadd.f32 %v990_v41, %v989_v38  ;;  %v970_v43 = vpop.f32.mrf.mxu0 }
 0x154   : > { %v992_v45 = vpop.f32.mrf.mxu1 }
 0x155   : > { %v652_v46 = vadd.f32 %v991_v42, %v969_v40  ;;  %v971_v47 = vpop.f32.mrf.mxu0 }
 0x156   : > { %v972_v48 = vadd.f32 %v971_v47, %v970_v43  ;;  %v993_v49 = vpop.f32.mrf.mxu1 }
 0x157   : > { %v658_v50 = vadd.f32 %v652_v46, %v294_v44  ;;  %v994_v51 = vadd.f32 %v993_v49, %v992_v45 }
 0x159   : > { %660 = vst [vmem:[#allocation2] sm:$0xff] %v658_v50  ;;  %v655_v53 = vadd.f32 %v994_v51, %v972_v48  ;;  %665 = sbr.rel (%p934_p3) target bundleno = 583 (0x247), region = 60 }
 0x15b   : > { %v659_v54 = vadd.f32 %v655_v53, %v295_v52 }
 0x15d   : > { %661 = vst [vmem:[#allocation2 + $0x8] sm:$0xff] %v659_v54 }
 0x15e   : > { %v1134_v55 = vld [vmem:[#allocation8 + $0x38] sm:$0xff]   ;;  %v1305_v56 = vmov 0.0   ;;  %v1135_v57 = vld [vmem:[#allocation8 + $0x30] sm:$0xff]   ;;  %vm1306_vm0 = vmmov 0   ;;  %v1136_v58 = vld [vmem:[#allocation8 + $0x28] sm:$0xff]  }
 0x15f   : > { %1004 = vmatprep.subr.bf16.mxu0 %v1305_v56  ;;  %1020 = vmatprep.mubr.msk.bf16.mxu0 %vm1306_vm0, %v1305_v56  ;;  %v1137_v59 = vld [vmem:[#allocation8 + $0x20] sm:$0xff]   ;;  %v1138_v60 = vld [vmem:[#allocation8 + $0x18] sm:$0xff]   ;;  %v1139_v61 = vld [vmem:[#allocation8 + $0x10] sm:$0xff]  }
 0x160   : > { %1005 = vmatpush3.bf16.msra.mxu0 %v1134_v55  ;;  %v1140_v62 = vld [vmem:[#allocation8 + $0x8] sm:$0xff]   ;;  %v666_v63 = vld [vmem:[#allocation2] sm:$0xff]  ;;  %v1141_v4 = vld [vmem:[#allocation8] sm:$0xff]  }
 0x161   : > { %1006 = vmatprep.subr.bf16.mxu0 %v1305_v56  ;;  %v935_v1 = vld [vmem:[%s1583_s2] ss:$0 sm:$0xff] }
 0x162   : > { %v675_v2 = vadd.f32 %v935_v1, %v666_v63  ;;  %v936_v6 = vld [vmem:[%s1585_s4] ss:$0 sm:$0xff] }
 0x164   : > { %1007 = vmatpush3.bf16.msra.mxu0 %v1135_v57  ;;  %v667_v0 = vld [vmem:[#allocation2 + $0x8] sm:$0xff] }
 0x165   : > { %1008 = vmatprep.subr.bf16.mxu0 %v1305_v56  ;;  %v676_v3 = vadd.f32 %v935_v1, %v667_v0 }
 0x167   : > { %v677_v5 = vpack.c.bf16 %v676_v3, %v675_v2 }
 0x168   : > { %1009 = vmatpush3.bf16.msra.mxu0 %v1136_v58 }
 0x169   : > { %1010 = vmatprep.subr.bf16.mxu0 %v1305_v56 }
 0x16c   : > { %1011 = vmatpush3.bf16.msra.mxu0 %v1137_v59 }
 0x16d   : > { %1012 = vmatprep.subr.bf16.mxu0 %v1305_v56 }
 0x170   : > { %1013 = vmatpush3.bf16.msra.mxu0 %v1138_v60 }
 0x171   : > { %1014 = vmatprep.subr.bf16.mxu0 %v1305_v56 }
 0x174   : > { %1015 = vmatpush3.bf16.msra.mxu0 %v1139_v61 }
 0x175   : > { %1016 = vmatprep.subr.bf16.mxu0 %v1305_v56 }
 0x178   : > { %1017 = vmatpush3.bf16.msra.mxu0 %v1140_v62 }
 0x179   : > { %1018 = vmatprep.subr.bf16.mxu0 %v1305_v56 }
 0x17c   : > { %1019 = vmatpush3.bf16.msra.mxu0 %v1141_v4 }
 0x17f   : > { %1021 = vmatmul.mubr.bf16.vlgmr.msra.gmra.mxu0 %v677_v5 }
 0x23f   : > { %v783_v7 = vpop.f32.mrf.mxu0 }
 0x240   : > { %v784_v8 = vadd.f32 %v936_v6, %v783_v7 }
 0x241   : > { %v1022_v9 = vpop.f32.mrf.mxu0 }
 0x242   : > { %790 = vst [vmem:[#allocation9] sm:$0xff] %v784_v8 }
 0x243   : > { %v786_v10 = vpop.f32.mrf.mxu0 }
 0x244   : > { %v787_v11 = vadd.f32 %v936_v6, %v786_v10 }
 0x245   : > { %v1023_v12 = vpop.f32.mrf.mxu0 }
 0x246   : > { %791 = vst [vmem:[#allocation9 + $0x8] sm:$0xff] %v787_v11 }
 0x247 PF: > { %p1050_p6 = scmp.eq.s32.totalorder %s1359_s22, 2  ;;  %s1307_s24 = smov [#allocation9]  }
 0x248   : > { %s798_s27 = sshll.u32 %s1307_s24, 4  ;;  %s799_s27 = int_to_ptr.vmem [resolvable:$true] %s798_s27 }
 0x249   : > { %s1224_s30 = scalar_lea.vmem %s799_s27, 256  ;;  %p1231_p9 = scmp.lt.s32.totalorder %s799_s27, %s799_s27 }
 0x24a   : > { %p1225_p7 = scmp.ne.s32.totalorder %s799_s27, %s1224_s30  ;;  %p1232_p13 = scmp.lt.s32.totalorder %s1224_s30, %s1224_s30 }
 0x24c   : > { %p1226_p11 = pnand %p1225_p7, %p1050_p6  ;;  %p1233_p8 = por %p1232_p13, %p1231_p9 }
 0x24e   : > { %p1227_p4 = pneg %p1226_p11 }
 0x250   : > { %p1234_p12 = pnand %p1233_p8, %p1227_p4 }
 0x252   : > { %1237 = shalt.err (!%p1234_p12)
}
 0x253   : > { %s1308_s7 = smov 128   ;;  %s1309_s6 = smov 8  }
 0x254   : > { %1033 = dma.vmem_to_hbm [thread:$0]  (%p1050_p6), %s799_s27, 256, %s1586_s5, [#allocation5], %s1308_s7, %s1308_s7, %s1309_s6  }
 0x255   : > { %1277 = dma.done.wait (%p1050_p6), [#allocation5], 256  }
 0x256   : > { %1279 = vsyncadd (%p1050_p6), [#allocation5], 4294967040 }
 0x257 PF: > { %p19_p2 = scmp.ge.s32.totalorder %s1362_s23, 5   ;;  %s1604_s18 = smov %s1286_s19 }
 0x258   : > { %s1605_s19 = smov %s1290_s20  ;;  %s1606_s20 = smov %s1372_s26 }
 0x259   : > { %s1607_s21 = smov %s1362_s23  ;;  %21 = sbr.rel (!%p19_p2) target bundleno = 8 (0x8), region = 102 }
 0x25e   :  { %814 = vsyncpa [#allocation4], 1 }
 0x25f   :  { %816 = vsyncpa [#allocation4 + $0x1], 1 }
 0x260   :  { %817 = vsyncpa [#allocation7], 1 }
 0x261   :  { %819 = vsyncpa [#allocation7 + $0x1], 1 }
 0x262   :  { %820 = vsyncpa [#allocation5], 1 }
 0x263   :  { %822 = vsyncpa [#allocation5 + $0x1], 1 }

</bundles_post_ra>
